<compile_context>
chip_gen: v5e
topology: v5e:2x2
jax: 0.10.0
libtpu: 0.0.40
codegen_flags: <defaults>
</compile_context>

<pallas_src>
import jax
import jax.numpy as jnp
from jax.experimental import pallas as pl
from jax.experimental.pallas import tpu as pltpu

_LANE = 128
_TARGET_BLOCK_BYTES = 2 << 20  # ~2 MiB blocks: safe w/ double buffering on all gens


def _sign_binarize_kernel(x_ref, o_ref):
    # 1-bit sign quantization: q(x) = +1 for x >= 0, -1 otherwise.
    x = x_ref[...]
    one = jnp.ones((), dtype=o_ref.dtype)
    o_ref[...] = jnp.where(x >= 0, one, -one).astype(o_ref.dtype)


def _native_sublane(dtype):
    # f32 -> 8, bf16 -> 16, int8/fp8 -> 32 (packed dtypes pack along sublanes).
    itemsize = jnp.dtype(dtype).itemsize
    return max(8, 32 // max(itemsize, 1))


def _pick_lane_width(n):
    # Widest lane-dense last dim (multiple of 128) that evenly divides n.
    for lw in (1024, 2048, 4096, 512, 256, 128):
        if n % lw == 0:
            return lw
    return None


def _pick_block_rows(rows, lane, dtype):
    sub = _native_sublane(dtype)
    itemsize = jnp.dtype(dtype).itemsize
    max_rows = max(_TARGET_BLOCK_BYTES // (lane * itemsize), sub)
    if rows <= max_rows:
        # Full-height block: a block dim equal to the full array dim is always legal.
        return rows
    # Multiple of the dtype-native sublane count; Pallas masks the ragged last block.
    return max((max_rows // sub) * sub, sub)


def _binarize_2d(x2d, block_rows):
    rows, lane = x2d.shape
    grid = (pl.cdiv(rows, block_rows),)
    return pl.pallas_call(
        _sign_binarize_kernel,
        out_shape=jax.ShapeDtypeStruct((rows, lane), x2d.dtype),
        grid_spec=pltpu.PrefetchScalarGridSpec(
            num_scalar_prefetch=0,
            grid=grid,
            in_specs=[pl.BlockSpec((block_rows, lane), lambda i: (i, 0))],
            out_specs=pl.BlockSpec((block_rows, lane), lambda i: (i, 0)),
        ),
        compiler_params=pltpu.CompilerParams(
            dimension_semantics=("parallel",),
        ),
    )(x2d)


def _check_quantization(quantize_train, quantize_eval, training):
    return (
        (quantize_train and training)
        or (quantize_eval and not training)
        or (quantize_train and quantize_eval)
    )


class QuantizedActivationPallas:
    """JAX/Pallas port of QuantizedActivation (error_model=None)."""

    def __init__(self, quantize_train=True, quantize_eval=True, training=False):
        self.quantize_train = quantize_train
        self.quantize_eval = quantize_eval
        self.training = training
        self.error_model = None  # no error model in this synthetic setup

    def __call__(self, x):
        if not _check_quantization(
            self.quantize_train, self.quantize_eval, self.training
        ):
            return x
        return self._quantize(x)

    @staticmethod
    def _quantize(x):
        orig_shape = x.shape
        dtype = x.dtype
        flat = x.reshape(-1)
        n = flat.shape[0]
        if n == 0:
            return x

        one = jnp.ones((), dtype=dtype)

        lane = _pick_lane_width(n)
        if lane is not None:
            # Fast path: whole tensor views as a lane-dense (rows, lane) slab.
            rows = n // lane
            block_rows = _pick_block_rows(rows, lane, dtype)
            out = _binarize_2d(flat.reshape(rows, lane), block_rows)
            return out.reshape(orig_shape)

        # Unaligned size: run the kernel over the 128-aligned bulk; the small
        # (<128 element) tail goes through plain jnp.where — no full-tensor
        # pad/slice round trips.
        n_bulk = (n // _LANE) * _LANE
        pieces = []
        if n_bulk:
            lane = _pick_lane_width(n_bulk)
            rows = n_bulk // lane
            block_rows = _pick_block_rows(rows, lane, dtype)
            bulk = _binarize_2d(flat[:n_bulk].reshape(rows, lane), block_rows)
            pieces.append(bulk.reshape(-1))
        tail = flat[n_bulk:]
        pieces.append(jnp.where(tail >= 0, one, -one).astype(dtype))
        out = jnp.concatenate(pieces) if len(pieces) > 1 else pieces[0]
        return out.reshape(orig_shape)


if __name__ == "__main__":
    key = jax.random.PRNGKey(0)
    # NCHW activation tensor, small shapes (batch=2, channels=4, spatial=16).
    x = jax.random.normal(key, (2, 4, 16, 16), dtype=jnp.float32)

    layer = QuantizedActivationPallas(
        quantize_train=True, quantize_eval=True, training=False
    )
    y = layer(x)
    y = jax.block_until_ready(y)

    # Reference check against plain JAX sign-binarization.
    ref = jnp.where(x >= 0, 1.0, -1.0).astype(x.dtype)
    assert y.shape == x.shape and y.dtype == x.dtype
    assert bool(jnp.all(y == ref))

    # Also exercise an unaligned size (tail path) and a bf16 input.
    x2 = jax.random.normal(jax.random.PRNGKey(1), (3, 5, 7), dtype=jnp.bfloat16)
    y2 = jax.block_until_ready(layer(x2))
    ref2 = jnp.where(x2 >= 0, 1.0, -1.0).astype(x2.dtype)
    assert y2.shape == x2.shape and y2.dtype == x2.dtype
    assert bool(jnp.all(y2 == ref2))

    print("KERNEL_OK")
</pallas_src>

<mosaic_0001>
module attributes {stable_mosaic.version = 11 : i64} {
  func.func @_sign_binarize_kernel(%arg0: i32, %arg1: memref<2x1024xf32, #tpu.memory_space<vmem>>, %arg2: memref<2x1024xf32, #tpu.memory_space<vmem>>) attributes {dimension_semantics = [#tpu.dimension_semantics<parallel>], iteration_bounds = array<i64: 1>, scalar_prefetch = 0 : i64, scratch_operands = 0 : i64, tpu.core_type = #tpu.core_type<tc>, window_params = [{transform_indices = @transform_0, window_bounds = array<i64: 2, 1024>}, {transform_indices = @transform_1, window_bounds = array<i64: 2, 1024>}]} {
    %c0 = arith.constant 0 : index
    %c0_0 = arith.constant 0 : index
    %0 = vector.load %arg1[%c0, %c0_0] : memref<2x1024xf32, #tpu.memory_space<vmem>>, vector<2x1024xf32>
    %cst = arith.constant 0.000000e+00 : f32
    %1 = vector.broadcast %cst : f32 to vector<2x1024xf32>
    %2 = arith.cmpf oge, %0, %1 : vector<2x1024xf32>
    %cst_1 = arith.constant 0.000000e+00 : f32
    %cst_2 = arith.constant 1.000000e+00 : f32
    %3 = arith.subf %cst_1, %cst_2 : f32
    %cst_3 = arith.constant 1.000000e+00 : f32
    %4 = vector.broadcast %cst_3 : f32 to vector<2x1024xf32>
    %5 = vector.broadcast %3 : f32 to vector<2x1024xf32>
    %6 = arith.select %2, %4, %5 : vector<2x1024xi1>, vector<2x1024xf32>
    %c0_4 = arith.constant 0 : index
    %c0_5 = arith.constant 0 : index
    %7 = vector.load %arg2[%c0_4, %c0_5] : memref<2x1024xf32, #tpu.memory_space<vmem>>, vector<2x1024xf32>
    tpu.vector_store %arg2[%c0_4, %c0_5], %6 {strides = array<i32>} : memref<2x1024xf32, #tpu.memory_space<vmem>>, vector<2x1024xf32>,
    return
  }
  func.func @transform_0(%arg0: i32) -> (i32, i32) {
    %c0_i32 = arith.constant 0 : i32
    %c0_i32_0 = arith.constant 0 : i32
    return %arg0, %c0_i32 : i32, i32
  }
  func.func @transform_1(%arg0: i32) -> (i32, i32) {
    %c0_i32 = arith.constant 0 : i32
    %c0_i32_0 = arith.constant 0 : i32
    return %arg0, %c0_i32 : i32, i32
  }
}

</mosaic_0001>

<bundles_post_ra>
// kernel: tpu_custom_call.1
= control target key start
LH: loop header
LB: loop body
LE: loop exit
PB: predicated region body
PF: predicated region fallthrough
CT: control target
= control target key end

     0   :  { %6 = vsyncpa [#allocation3], 0  ;;  %s122_s0 = inlined_call_operand.hbm [shape: f32[2,1024], index: 0, kind: input, shape index: {}]   ;;  %s123_s1 = inlined_call_operand.hbm [shape: f32[2,1024], index: 1, kind: output, shape index: {}]  }
   0x1   :  { %7 = vsyncpa [#allocation4], 0  ;;  %s13_s8 = sshll.u32 %s122_s0, 4  ;;  %s103_s9 = smov [#allocation2]   ;;  %s14_s8 = int_to_ptr.hbm [resolvable:$true] %s13_s8 }
   0x2   :  { %s15_s10 = sshll.u32 %s103_s9, 4  ;;  %s16_s10 = int_to_ptr.vmem [resolvable:$true] %s15_s10 }
   0x3   :  { %18 = dma.hbm_to_vmem [thread:$0]  %s14_s8, 256, %s16_s10, [#allocation3]  }
   0x4   :  { %99 = dma.done.wait [#allocation3], 256  }
   0x5   :  { %100 = vsyncadd [#allocation3], 4294967040  ;;  %s104_s11 = smov [#allocation5]   ;;  %s38_s15 = sshll.u32 %s123_s1, 4  ;;  %v23_v0 = vld [vmem:[#allocation2] sm:$0xff]  ;;  %v24_v1 = vld [vmem:[#allocation2 + $0x8] sm:$0xff]  ;;  %s39_s15 = int_to_ptr.hbm [resolvable:$true] %s38_s15 }
   0x6   :  { %s36_s12 = sshll.u32 %s104_s11, 4  ;;  %vm25_vm0 = vcmp.ge.f32.partialorder %v23_v0, 0.0  ;;  %vm26_vm1 = vcmp.ge.f32.partialorder %v24_v1, 0.0  ;;  %v105_v2 = vmov -1.0   ;;  %s37_s12 = int_to_ptr.vmem [resolvable:$true] %s36_s12 }
   0x7   :  { %v27_v3 = vsel %vm25_vm0, 1.0, %v105_v2  ;;  %v28_v4 = vsel %vm26_vm1, 1.0, %v105_v2 }
   0x8   :  { %29 = vst [vmem:[#allocation5] sm:$0xff] %v27_v3 }
   0x9   :  { %30 = vst [vmem:[#allocation5 + $0x8] sm:$0xff] %v28_v4 }
   0xa   :  { %41 = dma.vmem_to_hbm [thread:$0]  %s37_s12, 256, %s39_s15, [#allocation4]  }
   0xb   :  { %101 = dma.done.wait [#allocation4], 256  }
   0xc   :  { %102 = vsyncadd [#allocation4], 4294967040 }
   0xd   :  { %46 = vsyncpa [#allocation3], 1 }
   0xe   :  { %47 = vsyncpa [#allocation4], 1 }

</bundles_post_ra>
